<compile_context>
chip_gen: v6e
topology: v6e:2x2x1
jax: 0.10.0
libtpu: 0.0.40
codegen_flags: <defaults>
</compile_context>

<pallas_src>
import functools

import jax
import jax.numpy as jnp
from jax import lax
from jax.experimental import pallas as pl
from jax.experimental.pallas import tpu as pltpu


def _round_up(x, m):
    return ((x + m - 1) // m) * m


def _sublane(dtype):
    # Sublane packing multiple: 8 rows for 4-byte, 16 for 2-byte, 32 for 1-byte.
    return {4: 8, 2: 16, 1: 32}.get(jnp.dtype(dtype).itemsize, 8)


def _tcn_kernel(x_ref, halo_ref, w_ref, shift_ref, o_ref, *, k, dilation, l_tile):
    """One (batch, L-tile) grid step.

    x_ref     : (C_in_pad, l_tile)        input lanes [j*l_tile, (j+1)*l_tile)
    halo_ref  : (C_in_pad, halo_pad)      next halo_pad input lanes (dilated taps)
    w_ref     : (K, C_out_pad, C_in_pad)  per-tap conv weight, BN scale folded in
    shift_ref : (C_out_pad, 1)            beta + (bias - running_mean) * scale
    o_ref     : (C_out_pad, l_tile)
    """
    xcat = jnp.concatenate([x_ref[...], halo_ref[...]], axis=-1)   # (C_in_pad, LT+HP)
    acc = jnp.dot(w_ref[0], xcat[:, :l_tile], preferred_element_type=jnp.float32)
    for kk in range(1, k):                                         # static unroll
        off = kk * dilation
        acc = acc + jnp.dot(w_ref[kk], xcat[:, off:off + l_tile],
                            preferred_element_type=jnp.float32)
    y = acc + shift_ref[...]                                       # fused bias + BN shift
    o_ref[...] = jnp.maximum(y, 0.0).astype(o_ref.dtype)           # ReLU (+ eval dropout = id)


def tcn_block(x_ncl, weight, bias, gamma, beta, running_mean, running_var,
              *, kernel_size=3, dilation=1, eps=1e-5,
              compute_dtype=jnp.float32, out_dtype=jnp.float32, l_tile=None):
    """x_ncl: (N, C_in, L)  ->  (N, C_out, L_out) in NCL layout (eval mode)."""
    n, c_in, l = x_ncl.shape
    c_out = weight.shape[0]
    k = kernel_size
    padding = dilation * (k - 1)
    l_out = l + 2 * padding - dilation * (k - 1)                   # = l + padding

    in_b = jnp.dtype(compute_dtype).itemsize
    out_b = jnp.dtype(out_dtype).itemsize

    # ---- dtype-aware channel padding ----
    c_in_pad = _round_up(c_in, _sublane(compute_dtype))
    c_out_pad = _round_up(c_out, max(_sublane(compute_dtype), _sublane(out_dtype)))

    # ---- L tiling: big lane tiles sized from a per-step VMEM budget ----
    l_out_pad = _round_up(l_out, 128)
    per_lane = (2 * c_in_pad * in_b        # x block, double buffered
                + 2 * c_out_pad * out_b    # output block, double buffered
                + c_in_pad * in_b          # in-kernel concat copy
                + k * c_in_pad * in_b      # shifted tap slices
                + c_out_pad * 4)           # f32 accumulator
    budget_tile = max(256, ((12 << 20) // per_lane) // 128 * 128)
    cap = min(budget_tile, 8192)
    if l_tile is None:
        if l_out_pad <= cap:
            l_tile = l_out_pad
        else:
            # Largest multiple-of-128 divisor of l_out_pad within budget; fall
            # back to the cap (bounded rounding waste) if only tiny divisors exist.
            l_tile = 128
            t = cap
            while t >= 128:
                if l_out_pad % t == 0:
                    l_tile = t
                    break
                t -= 128
            if l_tile < min(1024, cap):
                l_tile = cap
    else:
        l_tile = max(128, _round_up(l_tile, 128))
    l_main = _round_up(l_out_pad, l_tile)
    grid_l = l_main // l_tile
    halo_pad = max(128, _round_up(padding, 128))

    # ---- stage input once: cast FIRST, then zero-pad (channels + conv padding) ----
    x_big = jnp.pad(x_ncl.astype(compute_dtype),
                    ((0, 0), (0, c_in_pad - c_in),
                     (padding, l_main + halo_pad - padding - l)))
    # Pre-gathered halo: lanes [(j+1)*l_tile, (j+1)*l_tile + halo_pad) for tile j
    # (tiny: halo_pad/l_tile of the input), so no fully-OOB reads are ever issued.
    halo_cols = [lax.slice_in_dim(x_big, (j + 1) * l_tile,
                                  (j + 1) * l_tile + halo_pad, axis=2)
                 for j in range(grid_l)]
    x_halo = halo_cols[0] if grid_l == 1 else jnp.concatenate(halo_cols, axis=2)

    # ---- fold BN scale into the conv weight (in f32), bias/mean/beta into shift ----
    scale = (gamma / jnp.sqrt(running_var + eps)).astype(jnp.float32)
    shift = (beta + (bias - running_mean) * scale).astype(jnp.float32)
    w_k = jnp.transpose(weight.astype(jnp.float32) * scale[:, None, None], (2, 0, 1))
    w_k = jnp.pad(w_k, ((0, 0), (0, c_out_pad - c_out),
                        (0, c_in_pad - c_in))).astype(compute_dtype)
    shift = jnp.pad(shift, (0, c_out_pad - c_out)).reshape(c_out_pad, 1)

    # ---- grid: both axes parallel; larger extent first (v7x megacore sharding) ----
    if n >= grid_l:
        grid = (n, grid_l)
        def _bj(b, j): return b, j
    else:
        grid = (grid_l, n)
        def _bj(j, b): return b, j

    def x_map(*g):
        b, j = _bj(*g)
        return (b, 0, j)

    def o_map(*g):
        b, j = _bj(*g)
        return (b, 0, j)

    def w_map(*g):
        return (0, 0, 0)

    def s_map(*g):
        return (0, 0)

    # ---- VMEM limit: actual double-buffered block bytes + headroom, <= 48 MiB ----
    block_bytes = (2 * c_in_pad * (l_tile + halo_pad) * in_b
                   + 2 * c_out_pad * l_tile * out_b
                   + 2 * k * c_out_pad * c_in_pad * in_b
                   + 2 * c_out_pad * 4)
    scratch_bytes = (c_in_pad * (l_tile + halo_pad) * in_b
                     + k * c_in_pad * l_tile * in_b
                     + c_out_pad * l_tile * 4)
    vmem_limit = max(32 << 20,
                     min(48 << 20,
                         int(1.5 * (block_bytes + scratch_bytes)) + (2 << 20)))

    cost = pl.CostEstimate(
        flops=2 * n * l_out * c_out * c_in * k,
        transcendentals=0,
        bytes_accessed=int(x_big.size * in_b + x_halo.size * in_b
                           + w_k.size * in_b + shift.size * 4
                           + n * c_out_pad * l_main * out_b))

    kernel = functools.partial(_tcn_kernel, k=k, dilation=dilation, l_tile=l_tile)

    out_padded = pl.pallas_call(
        kernel,
        out_shape=jax.ShapeDtypeStruct((n, c_out_pad, l_main), out_dtype),
        grid_spec=pltpu.PrefetchScalarGridSpec(
            num_scalar_prefetch=0,
            grid=grid,
            in_specs=[
                pl.BlockSpec((pl.Squeezed(), c_in_pad, l_tile), x_map),
                pl.BlockSpec((pl.Squeezed(), c_in_pad, halo_pad), x_map),
                pl.BlockSpec((k, c_out_pad, c_in_pad), w_map),
                pl.BlockSpec((c_out_pad, 1), s_map),
            ],
            out_specs=pl.BlockSpec((pl.Squeezed(), c_out_pad, l_tile), o_map),
        ),
        compiler_params=pltpu.CompilerParams(
            dimension_semantics=("parallel", "parallel"),
            vmem_limit_bytes=vmem_limit),
        cost_estimate=cost,
    )(x_big, x_halo, w_k, shift)

    # Strip channel / length padding; output stays NCL like the PyTorch module.
    return out_padded[:, :c_out, :l_out]


def _reference(x_ncl, weight, bias, gamma, beta, mean, var,
               *, kernel_size, dilation, eps=1e-5):
    """Pure-JAX reference (conv_general_dilated) for a sanity check."""
    padding = dilation * (kernel_size - 1)
    y = lax.conv_general_dilated(
        x_ncl, weight, window_strides=(1,), padding=[(padding, padding)],
        rhs_dilation=(dilation,),
        dimension_numbers=("NCH", "OIH", "NCH"))
    y = y + bias[None, :, None]
    y = (y - mean[None, :, None]) / jnp.sqrt(var[None, :, None] + eps)
    y = y * gamma[None, :, None] + beta[None, :, None]
    return jnp.maximum(y, 0.0)


def _make_params(key, c_in, c_out, k):
    kw, kb, kg, kbe, km, kv = jax.random.split(key, 6)
    fan_in = c_in * k
    bound = 1.0 / (fan_in ** 0.5)
    weight = jax.random.uniform(kw, (c_out, c_in, k), jnp.float32, -bound, bound)
    bias = jax.random.uniform(kb, (c_out,), jnp.float32, -bound, bound)
    gamma = jax.random.uniform(kg, (c_out,), jnp.float32, 0.5, 1.5)
    beta = 0.1 * jax.random.normal(kbe, (c_out,), jnp.float32)
    mean = 0.1 * jax.random.normal(km, (c_out,), jnp.float32)
    var = jax.random.uniform(kv, (c_out,), jnp.float32, 0.5, 1.5)
    return weight, bias, gamma, beta, mean, var


if __name__ == "__main__":
    key = jax.random.PRNGKey(0)
    k1, k2, k3, k4 = jax.random.split(key, 4)

    # --- Test 1: small shapes consistent with the module (batch=2, C_in=4, C_out=8, L=16) ---
    N, C_IN, C_OUT, L = 2, 4, 8, 16
    K, DIL = 3, 2
    x = jax.random.normal(k1, (N, C_IN, L), dtype=jnp.float32)
    params = _make_params(k2, C_IN, C_OUT, K)

    ref = _reference(x, *params, kernel_size=K, dilation=DIL)

    fn_f32 = jax.jit(functools.partial(tcn_block, kernel_size=K, dilation=DIL))
    out = jax.block_until_ready(fn_f32(x, *params))
    assert out.shape == (N, C_OUT, L + DIL * (K - 1))
    assert jnp.allclose(out, ref, atol=1e-4, rtol=1e-4)

    # bf16 MXU path (v6e/v7x): weights/inputs in bf16, f32 accumulate, f32 out.
    out_bf16 = jax.block_until_ready(
        tcn_block(x, *params, kernel_size=K, dilation=DIL,
                  compute_dtype=jnp.bfloat16))
    assert jnp.allclose(out_bf16, ref, atol=5e-2, rtol=5e-2)

    # bf16 output path (halves output HBM traffic when the consumer accepts it).
    out_bf16o = jax.block_until_ready(
        tcn_block(x, *params, kernel_size=K, dilation=DIL,
                  compute_dtype=jnp.bfloat16, out_dtype=jnp.bfloat16))
    assert jnp.allclose(out_bf16o.astype(jnp.float32), ref, atol=6e-2, rtol=6e-2)

    # --- Test 2: multi-tile L with explicit small l_tile to exercise the halo path ---
    N2, L2, DIL2 = 1, 300, 3
    x2 = jax.random.normal(k3, (N2, C_IN, L2), dtype=jnp.float32)
    params2 = _make_params(k4, C_IN, C_OUT, K)
    ref2 = _reference(x2, *params2, kernel_size=K, dilation=DIL2)
    out2 = jax.block_until_ready(
        tcn_block(x2, *params2, kernel_size=K, dilation=DIL2, l_tile=128))
    assert out2.shape == ref2.shape
    assert jnp.allclose(out2, ref2, atol=1e-4, rtol=1e-4)

    print("KERNEL_OK")
</pallas_src>

<mosaic_0001>
module attributes {stable_mosaic.version = 11 : i64} {
  func.func @_tcn_kernel(%arg0: i32, %arg1: i32, %arg2: memref<1x8x128xf32, #tpu.memory_space<vmem>>, %arg3: memref<1x8x128xf32, #tpu.memory_space<vmem>>, %arg4: memref<3x8x8xf32, #tpu.memory_space<vmem>>, %arg5: memref<8x1xf32, #tpu.memory_space<vmem>>, %arg6: memref<1x8x128xf32, #tpu.memory_space<vmem>>) attributes {dimension_semantics = [#tpu.dimension_semantics<parallel>, #tpu.dimension_semantics<parallel>], iteration_bounds = array<i64: 2, 1>, scalar_prefetch = 0 : i64, scratch_operands = 0 : i64, tpu.core_type = #tpu.core_type<tc>, window_params = [{transform_indices = @transform_0, window_bounds = array<i64: 1, 8, 128>}, {transform_indices = @transform_1, window_bounds = array<i64: 1, 8, 128>}, {pipeline_mode = #tpu.pipeline_mode<synchronous>, transform_indices = @transform_2, window_bounds = array<i64: 3, 8, 8>}, {pipeline_mode = #tpu.pipeline_mode<synchronous>, transform_indices = @transform_3, window_bounds = array<i64: 8, 1>}, {transform_indices = @transform_4, window_bounds = array<i64: 1, 8, 128>}]} {
    %c0 = arith.constant 0 : index
    %c0_0 = arith.constant 0 : index
    %c0_1 = arith.constant 0 : index
    %0 = vector.load %arg2[%c0, %c0_0, %c0_1] : memref<1x8x128xf32, #tpu.memory_space<vmem>>, vector<1x8x128xf32>
    %1 = vector.shape_cast %0 : vector<1x8x128xf32> to vector<8x128xf32>
    %c0_2 = arith.constant 0 : index
    %c0_3 = arith.constant 0 : index
    %c0_4 = arith.constant 0 : index
    %2 = vector.load %arg3[%c0_2, %c0_3, %c0_4] : memref<1x8x128xf32, #tpu.memory_space<vmem>>, vector<1x8x128xf32>
    %3 = vector.shape_cast %2 : vector<1x8x128xf32> to vector<8x128xf32>
    %4 = tpu.concatenate %1, %3 in 1 : vector<8x128xf32>, vector<8x128xf32> -> vector<8x256xf32>
    %c0_5 = arith.constant 0 : index
    %c0_6 = arith.constant 0 : index
    %c0_7 = arith.constant 0 : index
    %5 = vector.load %arg4[%c0_5, %c0_6, %c0_7] : memref<3x8x8xf32, #tpu.memory_space<vmem>>, vector<1x8x8xf32>
    %6 = vector.shape_cast %5 : vector<1x8x8xf32> to vector<8x8xf32>
    %7 = vector.extract_strided_slice %4 {offsets = [0, 0], sizes = [8, 128], strides = [1, 1]} : vector<8x256xf32> to vector<8x128xf32>
    %cst = arith.constant dense<0.000000e+00> : vector<8x128xf32>
    %8 = tpu.matmul %6, %7, %cst {dimension_numbers = #tpu.dot_dimension_numbers<[1], [0], [0], [1], [0, 0, 1, 1], [], []>} : vector<8x8xf32>, vector<8x128xf32>, vector<8x128xf32> -> vector<8x128xf32>
    %c1 = arith.constant 1 : index
    %c0_8 = arith.constant 0 : index
    %c0_9 = arith.constant 0 : index
    %9 = vector.load %arg4[%c1, %c0_8, %c0_9] : memref<3x8x8xf32, #tpu.memory_space<vmem>>, vector<1x8x8xf32>
    %10 = vector.shape_cast %9 : vector<1x8x8xf32> to vector<8x8xf32>
    %11 = vector.extract_strided_slice %4 {offsets = [0, 2], sizes = [8, 128], strides = [1, 1]} : vector<8x256xf32> to vector<8x128xf32>
    %cst_10 = arith.constant dense<0.000000e+00> : vector<8x128xf32>
    %12 = tpu.matmul %10, %11, %cst_10 {dimension_numbers = #tpu.dot_dimension_numbers<[1], [0], [0], [1], [0, 0, 1, 1], [], []>} : vector<8x8xf32>, vector<8x128xf32>, vector<8x128xf32> -> vector<8x128xf32>
    %13 = arith.addf %8, %12 : vector<8x128xf32>
    %c2 = arith.constant 2 : index
    %c0_11 = arith.constant 0 : index
    %c0_12 = arith.constant 0 : index
    %14 = vector.load %arg4[%c2, %c0_11, %c0_12] : memref<3x8x8xf32, #tpu.memory_space<vmem>>, vector<1x8x8xf32>
    %15 = vector.shape_cast %14 : vector<1x8x8xf32> to vector<8x8xf32>
    %16 = vector.extract_strided_slice %4 {offsets = [0, 4], sizes = [8, 128], strides = [1, 1]} : vector<8x256xf32> to vector<8x128xf32>
    %cst_13 = arith.constant dense<0.000000e+00> : vector<8x128xf32>
    %17 = tpu.matmul %15, %16, %cst_13 {dimension_numbers = #tpu.dot_dimension_numbers<[1], [0], [0], [1], [0, 0, 1, 1], [], []>} : vector<8x8xf32>, vector<8x128xf32>, vector<8x128xf32> -> vector<8x128xf32>
    %18 = arith.addf %13, %17 : vector<8x128xf32>
    %c0_14 = arith.constant 0 : index
    %c0_15 = arith.constant 0 : index
    %19 = vector.load %arg5[%c0_14, %c0_15] : memref<8x1xf32, #tpu.memory_space<vmem>>, vector<8x1xf32>
    %20 = vector.broadcast %19 : vector<8x1xf32> to vector<8x128xf32>
    %21 = arith.addf %18, %20 : vector<8x128xf32>
    %cst_16 = arith.constant 0.000000e+00 : f32
    %22 = vector.broadcast %cst_16 : f32 to vector<8x128xf32>
    %23 = arith.maximumf %21, %22 : vector<8x128xf32>
    %c0_17 = arith.constant 0 : index
    %c0_18 = arith.constant 0 : index
    %c0_19 = arith.constant 0 : index
    %24 = vector.load %arg6[%c0_17, %c0_18, %c0_19] : memref<1x8x128xf32, #tpu.memory_space<vmem>>, vector<1x8x128xf32>
    %25 = vector.shape_cast %24 : vector<1x8x128xf32> to vector<8x128xf32>
    %26 = vector.shape_cast %23 : vector<8x128xf32> to vector<1x8x128xf32>
    tpu.vector_store %arg6[%c0_17, %c0_18, %c0_19], %26 {strides = array<i32>} : memref<1x8x128xf32, #tpu.memory_space<vmem>>, vector<1x8x128xf32>,
    return
  }
  func.func @transform_0(%arg0: i32, %arg1: i32) -> (i32, i32, i32) {
    %c0_i32 = arith.constant 0 : i32
    %c0_i32_0 = arith.constant 0 : i32
    return %arg0, %c0_i32, %arg1 : i32, i32, i32
  }
  func.func @transform_1(%arg0: i32, %arg1: i32) -> (i32, i32, i32) {
    %c0_i32 = arith.constant 0 : i32
    %c0_i32_0 = arith.constant 0 : i32
    return %arg0, %c0_i32, %arg1 : i32, i32, i32
  }
  func.func @transform_2(%arg0: i32, %arg1: i32) -> (i32, i32, i32) {
    %c0_i32 = arith.constant 0 : i32
    %c0_i32_0 = arith.constant 0 : i32
    %c0_i32_1 = arith.constant 0 : i32
    %c0_i32_2 = arith.constant 0 : i32
    return %c0_i32, %c0_i32_0, %c0_i32_1 : i32, i32, i32
  }
  func.func @transform_3(%arg0: i32, %arg1: i32) -> (i32, i32) {
    %c0_i32 = arith.constant 0 : i32
    %c0_i32_0 = arith.constant 0 : i32
    %c0_i32_1 = arith.constant 0 : i32
    return %c0_i32, %c0_i32_0 : i32, i32
  }
  func.func @transform_4(%arg0: i32, %arg1: i32) -> (i32, i32, i32) {
    %c0_i32 = arith.constant 0 : i32
    %c0_i32_0 = arith.constant 0 : i32
    return %arg0, %c0_i32, %arg1 : i32, i32, i32
  }
}

</mosaic_0001>

<bundles_post_ra>
// kernel: tcn_block.1
= control target key start
LH: loop header
LB: loop body
LE: loop exit
PB: predicated region body
PF: predicated region fallthrough
CT: control target
= control target key end

     0   :  { %9 = vsyncpa [#allocation3], 0  ;;  %s936_s0 = inlined_call_operand.vmem [shape: f32[2,8,256], index: 0, kind: input, shape index: {}]   ;;  %s937_s1 = inlined_call_operand.vmem [shape: f32[2,8,128], index: 1, kind: input, shape index: {}]   ;;  %s938_s2 = inlined_call_operand.vmem [shape: f32[3,8,8], index: 2, kind: input, shape index: {}]   ;;  %s939_s3 = inlined_call_operand.vmem [shape: f32[8,1], index: 3, kind: input, shape index: {}]   ;;  %s940_s4 = inlined_call_operand.hbm [shape: f32[2,8,128], index: 4, kind: output, shape index: {}]  }
   0x1   :  { %11 = vsyncpa [#allocation3 + $0x1], 0  ;;  %s816_s15 = smov 0   ;;  %s818_s16 = smov 0  }
   0x2   :  { %s820_s17 = smov 0   ;;  %s822_s18 = smov 0  }
   0x3   :  { %s824_s19 = smov 0   ;;  %s826_s20 = smov 0  }
   0x4 LB: > { %s606_s21 = sadd.s32 4294967295, %s783_s20   ;;  %s607_s22 = sadd.s32 4294967294, %s783_s20   ;;  %s783_s20 = sphi %s826_s20, %s17_s20   ;;  %s779_s19 = sphi %s824_s19, %s947_s19   ;;  %s775_s18 = sphi %s822_s18, %s946_s18   ;;  %s771_s17 = sphi %s820_s17, %s945_s17   ;;  %s767_s16 = sphi %s818_s16, %s944_s16   ;;  %s763_s15 = sphi %s816_s15, %s943_s15  }
   0x5   : > { %s29_s23 = sadd.s32 1, %s779_s19  ;;  %s136_s24 = sadd.s32 1, %s771_s17 }
   0x6   : > { %p31_p0 = scmp.ge.s32.totalorder %s29_s23, 2  ;;  %p146_p1 = scmp.ne.s32.totalorder %s771_s17, %s767_s16 }
   0x7   : > { %p147_p2 = scmp.eq.s32.totalorder %s606_s21, 1  ;;  %p152_p3 = scmp.ne.s32.totalorder %s767_s16, %s763_s15 }
   0x8   : > { %s949_s23 = smov (%p31_p0, %s29_s23), 0  ;;  %p153_p5 = scmp.eq.s32.totalorder %s607_s22, 1 }
   0x9   : > { %p856_p4 = por %p147_p2, %p146_p1  ;;  %s131_s26 = ssub.s32 %s779_s19, %s949_s23 }
   0xa   : > { %p610_p6 = scmp.ge.s32.totalorder %s783_s20, 1  ;;  %p134_p7 = scmp.eq.s32.totalorder %s131_s26, 0 }
   0xb   : > { %p863_p8 = por %p153_p5, %p152_p3  ;;  %p198_p9 = scmp.lt.s32.totalorder %s783_s20, 3 }
   0xc   : > { %s869_s28 = scalar_select %p134_p7, %s771_s17, %s136_s24  }
   0xd   : > { %p199_p10 = pnand %p610_p6, %p198_p9 }
   0xe   : > { %p234_p11 = scmp.lt.s32.totalorder (!%p199_p10), %s775_s18, 1  ;;  %s788_s14 = smov (!%p199_p10), 124  }
   0xf   : > { %202 = sbr.rel (%p199_p10) target bundleno = 362 (0x16a), region = 36  ;;  %s789_s21 = smov (!%p199_p10), 126  }
  0x10   : > { %s231_s6 = sand.u32 (!%p199_p10), 1, %s767_s16   ;;  %s790_s22 = smov (!%p199_p10), [#allocation2]  }
  0x11   : > { %s611_s7 = sshll.u32 (!%p199_p10), %s231_s6, 3  ;;  %s711_s24 = sshll.u32 (!%p199_p10), %s790_s22, 4  ;;  %s712_s24 = int_to_ptr.vmem [resolvable:$false] %s711_s24 }
  0x12   : > { %s233_s9 = scalar_lea.vmem (!%p199_p10), [#allocation2], %s611_s7 }
  0x13   : > { %s517_s10 = sshll.u32 (!%p199_p10), %s233_s9, 4  ;;  %s518_s10 = int_to_ptr.vmem [resolvable:$true] %s517_s10 }
  0x14   : > { %v785_v0 = vmov 0.0   ;;  %vm786_vm0 = vmmov 0   ;;  %s235_s29 = scalar_select %p234_p11, %s775_s18, 1  ;;  %v787_v1 = vmov 0   ;;  %vm263_vm1 = vcmask 64512   ;;  %v251_v3 = vld [vmem:[%s938_s2] sm:$0xff] }
  0x15   : > { %631 = vmatprep.subr.mxu0 %v785_v0  ;;  %633 = vmatprep.mubr.msk.f32.mxu0 %vm786_vm0, %v785_v0  ;;  %v493_v5 = vld [vmem:[%s939_s3] sm:$0xff]  ;;  %vm260_vm2 = vcmask 1031168   ;;  %vm416_vm3 = vcmask 1014784   ;;  %v615_v10 = vld [vmem:[%s938_s2 + $0x8] sm:$0xff]  ;;  %v618_v13 = vld [vmem:[%s938_s2 + $0x10] sm:$0xff]  ;;  %p714_p1 = scmp.lt.s32.totalorder %s518_s10, %s712_s24 }
  0x16   : > { %636 = vmatprep.subr.mxu1 %v785_v0  ;;  %638 = vmatprep.mubr.msk.f32.mxu1 %vm786_vm0, %v785_v0  ;;  %s624_s30 = sshll.u32 %s235_s29, 4  ;;  %s614_s5 = sshll.u32 %s235_s29, 3 }
  0x17   : > { %s241_s8 = scalar_lea.vmem %s936_s0, %s624_s30  ;;  %s248_s11 = scalar_lea.vmem %s937_s1, %s614_s5  ;;  %706 = vset.pattern.permute.xlu0 %v787_v1 }
  0x18   : > { %v249_v2 = vld [vmem:[%s241_s8] sm:$0xff]  ;;  %s621_s8 = sshll.u32 %s775_s18, 7  ;;  %s713_s18 = scalar_lea.vmem %s712_s24, 256 }
  0x19   : > { %412 = vrot.lane.b32.xlu1 %v249_v2, %s788_s14  ;;  %256 = vrot.lane.b32.xlu0 %v249_v2, %s789_s21  ;;  %v250_v4 = vld [vmem:[%s248_s11] sm:$0xff]  ;;  %s515_s13 = scalar_lea.hbm %s940_s4, %s621_s8 }
  0x1a   : > { %637 = vmatpush3.msra.mxu1 %v249_v2 }
  0x1b   : > { %639 = vmatmul.mubr.msk.f32.vlgmr.msra.gmra.mxu1 %vm263_vm1, %v251_v3 }
  0x1d   : > { %414 = vrot.lane.b32.xlu1 %v250_v4, %s788_s14  ;;  %258 = vrot.lane.b32.xlu0 %v250_v4, %s789_s21  ;;  %s503_s14 = scalar_lea.sflag [#allocation3], %s231_s6  ;;  %s707_s21 = scalar_lea.vmem %s518_s10, 128 }
  0x1e   : > { %p708_p12 = scmp.ne.s32.totalorder %s518_s10, %s707_s21  ;;  %p715_p2 = scmp.lt.s32.totalorder %s713_s18, %s707_s21 }
  0x20   : > { %p709_p13 = pnand %p708_p12, %p856_p4  ;;  %p716_p3 = por %p715_p2, %p714_p1 }
  0x21   : > { %496 = vperm.xlu0 %706, %v493_v5  }
  0x22   : > { %p710_p0 = pneg %p709_p13 }
  0x24   : > { %p717_p5 = pnand %p716_p3, %p710_p0 }
  0x8b   : > { %v413_v6 = vpop.permute.xlu1 %412  ;;  %v257_v7 = vpop.permute.xlu0 %256 }
  0x8f   : > { %v415_v8 = vpop.permute.xlu1 %414  ;;  %v259_v9 = vpop.permute.xlu0 %258 }
  0x90   : > { %v261_v11 = vsel %vm260_vm2, %v257_v7, %v259_v9  ;;  %v417_v12 = vsel %vm416_vm3, %v413_v6, %v415_v8 }
  0x91   : > { %632 = vmatpush3.msra.mxu0 %v261_v11 }
  0x92   : > { %634 = vmatmul.mubr.msk.f32.vlgmr.msra.gmra.mxu0 %vm263_vm1, %v615_v10  ;;  %641 = vmatprep.subr.mxu0 %v785_v0 }
  0x93   : > { %642 = vmatpush3.msra.mxu0 %v417_v12  ;;  %643 = vmatprep.mubr.msk.f32.mxu0 %vm786_vm0, %v785_v0 }
  0x96   : > { %644 = vmatmul.mubr.msk.f32.vlgmr.msra.gmra.mxu0 %vm263_vm1, %v618_v13 }
  0x9c   : > { %v497_v20 = vpop.permute.xlu0 %496 }
  0xdb   : > { %v406_v14 = vpop.f32.mrf.mxu1 }
  0xdd   : > { %v640_v15 = vpop.f32.mrf.mxu1 }
 0x152   : > { %v333_v16 = vpop.f32.mrf.mxu0 }
 0x153   : > { %v407_v18 = vadd.f32 %v406_v14, %v333_v16 }
 0x154   : > { %v635_v17 = vpop.f32.mrf.mxu0 }
 0x156   : > { %v488_v19 = vpop.f32.mrf.mxu0 }
 0x157   : > { %v492_v21 = vadd.f32 %v488_v19, %v407_v18 }
 0x158   : > { %v645_v22 = vpop.f32.mrf.mxu0 }
 0x159   : > { %v499_v23 = vadd.f32 %v497_v20, %v492_v21 }
 0x15b   : > { %v500_v24 = vmax.f32 %v499_v23, 0.0 }
 0x15d   : > { %501 = vst [vmem:[%s233_s9] sm:$0xff] %v500_v24 }
 0x15e   : > { %720 = shalt.err (!%p717_p5)
}
 0x15f   : > { %s721_s26 = scalar_lea.hbm %s515_s13, 128  ;;  %s725_s5 = scalar_lea.hbm %s940_s4, 256 }
 0x160   : > { %p722_p6 = scmp.ne.s32.totalorder %s515_s13, %s721_s26  ;;  %p726_p10 = scmp.lt.s32.totalorder %s515_s13, %s940_s4 }
 0x161   : > { %p727_p11 = scmp.lt.s32.totalorder %s725_s5, %s721_s26 }
 0x162   : > { %p723_p7 = pnand %p722_p6, %p856_p4 }
 0x163   : > { %p728_p12 = por %p727_p11, %p726_p10 }
 0x164   : > { %p724_p9 = pneg %p723_p7 }
 0x166   : > { %p729_p13 = pnand %p728_p12, %p724_p9 }
 0x168   : > { %732 = shalt.err (!%p729_p13)
}
 0x169   : > { %646 = dma.vmem_to_hbm [thread:$0]  (%p856_p4), %s518_s10, 128, %s515_s13, %s503_s14  }
 0x16a PF: > { %p652_p0 = scmp.ge.s32.totalorder %s783_s20, 2  ;;  %s529_s8 = sand.u32 1, %s763_s15  }
 0x16b   : > { %s530_s9 = scalar_lea.sflag [#allocation3], %s529_s8 }
 0x16c   : > { %p649_p1 = pnand %p652_p0, %p863_p8 }
 0x16e   : > { %p650_p2 = pneg %p649_p1 }
 0x170   : > { %758 = dma.done.wait (%p650_p2), %s530_s9, 128  }
 0x171   : > { %760 = vsyncadd (%p650_p2), %s530_s9, 4294967168  ;;  %s17_s20 = sadd.s32 1, %s783_s20   ;;  %s943_s15 = smov %s767_s16 }
 0x172   : > { %p14_p3 = scmp.ge.s32.totalorder %s17_s20, 4   ;;  %s944_s16 = smov %s771_s17 }
 0x173   : > { %s945_s17 = smov %s869_s28  ;;  %s946_s18 = smov %s779_s19 }
 0x174   : > { %s947_s19 = smov %s949_s23  ;;  %16 = sbr.rel (!%p14_p3) target bundleno = 4 (0x4), region = 76 }
 0x179   :  { %535 = vsyncpa [#allocation3], 1 }
 0x17a   :  { %537 = vsyncpa [#allocation3 + $0x1], 1 }

</bundles_post_ra>
